<compile_context>
chip_gen: v5e
topology: v5e:2x2
jax: 0.10.0
libtpu: 0.0.40
codegen_flags: <defaults>
</compile_context>

<pallas_src>
import functools
import math

import numpy as np
import jax
import jax.numpy as jnp
from jax import lax
from jax.experimental import pallas as pl
from jax.experimental.pallas import tpu as pltpu


# Fixed Sinkhorn hyper-parameters from the reference module
# (SemiCurrSinkhornKnopp_stable(num_iters=3, epsilon=0.1, ...)).
_EPS = 0.1
_INV_EPS = 1.0 / _EPS
_NUM_ITERS = 3


# ---------------- host-side (pure python / numpy) rho schedule ----------------
def sigmoid_rampup(current, rampup_length):
    """Exponential rampup from https://arxiv.org/abs/1610.02242"""
    if rampup_length == 0:
        return 1.0
    current = np.clip(current, 0.0, rampup_length)
    phase = 1.0 - current / rampup_length
    return float(np.exp(-5.0 * phase * phase))


def set_rho(rho_strategy, current, total, rho_upper, rho_base):
    if rho_strategy == 'sigmoid':
        rho = sigmoid_rampup(current, total) * rho_upper + rho_base
    elif rho_strategy == 'linear':
        rho = current / total * rho_upper + rho_base
    else:
        raise NotImplementedError
    if rho > 1.0:
        rho = min(rho, 1.0)
    return rho


# ------------------------------ Pallas kernel ---------------------------------
def _logsumexp(x, axis):
    m = jnp.max(x, axis=axis, keepdims=True)
    return jnp.log(jnp.sum(jnp.exp(x - m), axis=axis, keepdims=True)) + m


def ot_attn_kernel(true_n, true_m, relax_ref, x_ref, y_ref, flow_ref, dist_ref):
    # x: (n_pad, D), y: (m_pad, D); padded rows are zeros.
    x = x_ref[...].astype(jnp.float32)
    y = y_ref[...].astype(jnp.float32)

    n_pad, d = x.shape
    m_pad = y.shape[0]

    # Validity masks for the padded (lane-dense) layout.
    col_mask = lax.broadcasted_iota(jnp.int32, (1, m_pad), 1) < true_m   # (1, m_pad)
    row_mask = lax.broadcasted_iota(jnp.int32, (n_pad, 1), 0) < true_n   # (n_pad, 1)
    mask2d = jnp.logical_and(row_mask, col_mask)                         # (n_pad, m_pad)

    # normalize_feature: subtract per-row min over the feature axis.
    x = x - jnp.min(x, axis=-1, keepdims=True)
    y = y - jnp.min(y, axis=-1, keepdims=True)

    # torch.cdist (p=2): ||x_i - y_j|| via ||x||^2 + ||y||^2 - 2 <x_i, y_j>.
    # Both contractions over D go through the MXU; ||y||^2 comes out of the MXU
    # already lane-major as (1, m_pad) (no sublane->lane relayout).
    x2 = jnp.sum(x * x, axis=-1, keepdims=True)                          # (n_pad, 1)
    ones_row = jnp.ones((1, d), jnp.float32)
    y2 = lax.dot_general(ones_row, y * y,
                         dimension_numbers=(((1,), (1,)), ((), ())),
                         preferred_element_type=jnp.float32)             # (1, m_pad)
    xy = lax.dot_general(x, y,
                         dimension_numbers=(((1,), (1,)), ((), ())),
                         preferred_element_type=jnp.float32)             # (n_pad, m_pad)
    cost = jnp.sqrt(jnp.maximum(x2 + y2 - 2.0 * xy, 0.0))
    # Zero the padded entries so they never influence cmax / dist (costs >= 0).
    cost = jnp.where(mask2d, cost, 0.0)

    # cost / cost.max(), fused with the 1/eps scaling of the Sinkhorn loop:
    # cost_s = cost * (inv_eps / cmax).  Guard against an all-zero cost matrix.
    cmax = jnp.max(cost, axis=1, keepdims=True)                          # (n_pad, 1)
    cmax = jnp.max(cmax, axis=0, keepdims=True)                          # (1, 1)
    cmax = jnp.maximum(cmax, jnp.float32(1e-30))
    scale = _INV_EPS * pl.reciprocal(cmax, approx=True)                  # EUP vrcp
    cost_s = cost * scale                                                # (cost/cmax)/eps

    log_a = -math.log(true_n)   # uniform row marginal (prior=None), true N
    log_b = -math.log(true_m)   # uniform column marginal, true M

    # relax_ratio = rho / (rho + eps) = (eps*rho/(rho+eps)) / eps, precomputed
    # on host and passed as an SMEM runtime scalar (no recompile when rho moves).
    relax_ratio = relax_ref[0]

    neg_inf = -jnp.inf

    # TODO(synk): exact SemiCurrSinkhornKnopp_stable source was not provided; this
    # is a log-stabilized semi-relaxed Sinkhorn (hard column marginal, row marginal
    # relaxed with strength rho), num_iters=3, epsilon=0.1, transported mass = rho.
    # Potentials are carried in eps-scaled form: fs = f/eps, gs = g/eps.
    def body(_, carry):
        fs, gs = carry
        zg = jnp.where(row_mask, fs - cost_s, neg_inf)          # pad rows excluded
        gs = log_b - _logsumexp(zg, axis=0)                     # (1, m_pad)
        zf = jnp.where(col_mask, gs - cost_s, neg_inf)          # pad cols excluded
        fs = relax_ratio * (log_a - _logsumexp(zf, axis=1))     # (n_pad, 1)
        return fs, gs

    fs0 = jnp.zeros((n_pad, 1), jnp.float32)
    gs0 = jnp.zeros((1, m_pad), jnp.float32)
    fs, gs = lax.fori_loop(0, _NUM_ITERS, body, (fs0, gs0), unroll=True)

    # sk output has mass rho (flow_sk = rho * plan) and OT() divides by rho,
    # so flow == plan exactly; the rho*plan/rho round-trip is dropped.
    flow = jnp.where(mask2d, jnp.exp(fs + gs - cost_s), 0.0)

    flow_ref[...] = flow.astype(flow_ref.dtype)
    # dist = sum((cost/cmax) * flow) = eps * sum(cost_s * flow)  -> SMEM scalar.
    dist_ref[0, 0] = _EPS * jnp.sum(cost_s * flow)


# ------------------------------ Python wrapper ---------------------------------
def _round_up(v, mult):
    return max(mult, ((v + mult - 1) // mult) * mult)


def ot_attn_forward(x, y, iterations=0, iterations_per_epoch=20):
    """
    x: (N, D), y: (M, D)  ->  (pi: (N, M), dist: scalar)
    Mirrors OT_Attn(impl='hot').forward.
    """
    rho = set_rho(rho_strategy='sigmoid', current=iterations,
                  total=10 * iterations_per_epoch, rho_upper=1, rho_base=0.1)

    N, D = x.shape
    M, D2 = y.shape
    assert D == D2

    # Pad to a lane-dense working set: N up to a sublane multiple (8), M up to a
    # lane multiple (128).  Padded rows are zero and are masked inside the kernel.
    n_pad = _round_up(N, 8)
    m_pad = _round_up(M, 128)
    x_p = x if n_pad == N else jnp.pad(x, ((0, n_pad - N), (0, 0)))
    y_p = y if m_pad == M else jnp.pad(y, ((0, m_pad - M), (0, 0)))

    # relax_ratio = rho / (rho + eps)  (== relax_eps * inv_eps), SMEM runtime scalar.
    relax_ratio = jnp.full((1,), rho / (rho + _EPS), dtype=jnp.float32)

    kernel = functools.partial(ot_attn_kernel, N, M)

    flow_p, dist = pl.pallas_call(
        kernel,
        out_shape=(
            jax.ShapeDtypeStruct((n_pad, m_pad), jnp.float32),
            jax.ShapeDtypeStruct((1, 1), jnp.float32),
        ),
        in_specs=[
            pl.BlockSpec(memory_space=pltpu.MemorySpace.SMEM),   # rho-derived scalar
            pl.BlockSpec(memory_space=pltpu.MemorySpace.VMEM),   # x (padded)
            pl.BlockSpec(memory_space=pltpu.MemorySpace.VMEM),   # y (padded)
        ],
        out_specs=(
            pl.BlockSpec(memory_space=pltpu.MemorySpace.VMEM),   # flow (n_pad, m_pad)
            pl.BlockSpec(memory_space=pltpu.MemorySpace.SMEM),   # dist scalar
        ),
    )(relax_ratio, x_p, y_p)

    # TODO(synk): for many bags / production-scale N, wrap this in a batched
    # "parallel" grid (dist accumulated over an "arbitrary" axis) instead of
    # per-problem launches; kept single-problem here to match the module forward.
    flow = flow_p[:N, :M]
    return flow, dist[0, 0]


if __name__ == "__main__":
    key = jax.random.PRNGKey(0)
    kx, ky = jax.random.split(key)
    # x: (N, D) patch features, y: (M, D) prototype features
    x = jax.random.normal(kx, (16, 32), dtype=jnp.float32)
    y = jax.random.normal(ky, (8, 32), dtype=jnp.float32)

    pi, dist = ot_attn_forward(x, y, iterations=0, iterations_per_epoch=20)
    jax.block_until_ready((pi, dist))

    assert pi.shape == (16, 8) and pi.dtype == jnp.float32
    assert dist.shape == () and bool(jnp.isfinite(dist))
    assert bool(jnp.all(jnp.isfinite(pi)))
    print("KERNEL_OK")
</pallas_src>

<mosaic_0001>
module attributes {stable_mosaic.version = 11 : i64} {
  func.func @ot_attn_kernel(%arg0: memref<1xf32, #tpu.memory_space<smem>>, %arg1: memref<16x32xf32, #tpu.memory_space<vmem>>, %arg2: memref<128x32xf32, #tpu.memory_space<vmem>>, %arg3: memref<16x128xf32, #tpu.memory_space<vmem>>, %arg4: memref<1x1xf32, #tpu.memory_space<smem>>) attributes {dimension_semantics = [], scalar_prefetch = 0 : i64, scratch_operands = 0 : i64, tpu.core_type = #tpu.core_type<tc>} {
    %c0 = arith.constant 0 : index
    %c0_0 = arith.constant 0 : index
    %0 = vector.load %arg1[%c0, %c0_0] : memref<16x32xf32, #tpu.memory_space<vmem>>, vector<16x32xf32>
    %c0_1 = arith.constant 0 : index
    %c0_2 = arith.constant 0 : index
    %1 = vector.load %arg2[%c0_1, %c0_2] : memref<128x32xf32, #tpu.memory_space<vmem>>, vector<128x32xf32>
    %2 = tpu.iota {dimensions = array<i32: 1>} : vector<1x128xi32>
    %c8_i32 = arith.constant 8 : i32
    %3 = vector.broadcast %c8_i32 : i32 to vector<1x128xi32>
    %4 = arith.cmpi slt, %2, %3 : vector<1x128xi32>
    %5 = tpu.iota {dimensions = array<i32: 0>} : vector<16x1xi32>
    %c16_i32 = arith.constant 16 : i32
    %6 = vector.broadcast %c16_i32 : i32 to vector<16x1xi32>
    %7 = arith.cmpi slt, %5, %6 : vector<16x1xi32>
    %8 = vector.broadcast %7 : vector<16x1xi1> to vector<16x128xi1>
    %9 = vector.broadcast %4 : vector<1x128xi1> to vector<16x128xi1>
    %10 = arith.andi %8, %9 : vector<16x128xi1>
    %cst = arith.constant dense<0x7F800000> : vector<16xf32>
    %11 = vector.multi_reduction <minimumf>, %0, %cst [1] : vector<16x32xf32> to vector<16xf32>
    %12 = vector.shape_cast %11 : vector<16xf32> to vector<16x1xf32>
    %13 = vector.broadcast %12 : vector<16x1xf32> to vector<16x32xf32>
    %14 = arith.subf %0, %13 : vector<16x32xf32>
    %cst_3 = arith.constant dense<0x7F800000> : vector<128xf32>
    %15 = vector.multi_reduction <minimumf>, %1, %cst_3 [1] : vector<128x32xf32> to vector<128xf32>
    %16 = vector.shape_cast %15 : vector<128xf32> to vector<128x1xf32>
    %17 = vector.broadcast %16 : vector<128x1xf32> to vector<128x32xf32>
    %18 = arith.subf %1, %17 : vector<128x32xf32>
    %19 = arith.mulf %14, %14 : vector<16x32xf32>
    %cst_4 = arith.constant dense<0.000000e+00> : vector<16xf32>
    %20 = vector.multi_reduction <add>, %19, %cst_4 [1] : vector<16x32xf32> to vector<16xf32>
    %21 = vector.shape_cast %20 : vector<16xf32> to vector<16x1xf32>
    %cst_5 = arith.constant 1.000000e+00 : f32
    %22 = vector.broadcast %cst_5 : f32 to vector<1x32xf32>
    %23 = arith.mulf %18, %18 : vector<128x32xf32>
    %cst_6 = arith.constant dense<0.000000e+00> : vector<1x128xf32>
    %24 = tpu.matmul %22, %23, %cst_6 {dimension_numbers = #tpu.dot_dimension_numbers<[1], [1], [0], [0], [0, 0, 1, 0], [], []>} : vector<1x32xf32>, vector<128x32xf32>, vector<1x128xf32> -> vector<1x128xf32>
    %cst_7 = arith.constant dense<0.000000e+00> : vector<16x128xf32>
    %25 = tpu.matmul %14, %18, %cst_7 {dimension_numbers = #tpu.dot_dimension_numbers<[1], [1], [0], [0], [0, 0, 1, 0], [], []>} : vector<16x32xf32>, vector<128x32xf32>, vector<16x128xf32> -> vector<16x128xf32>
    %26 = vector.broadcast %21 : vector<16x1xf32> to vector<16x128xf32>
    %27 = vector.broadcast %24 : vector<1x128xf32> to vector<16x128xf32>
    %28 = arith.addf %26, %27 : vector<16x128xf32>
    %cst_8 = arith.constant 2.000000e+00 : f32
    %29 = vector.broadcast %cst_8 : f32 to vector<16x128xf32>
    %30 = arith.mulf %29, %25 : vector<16x128xf32>
    %31 = arith.subf %28, %30 : vector<16x128xf32>
    %cst_9 = arith.constant 0.000000e+00 : f32
    %32 = vector.broadcast %cst_9 : f32 to vector<16x128xf32>
    %33 = arith.maximumf %31, %32 : vector<16x128xf32>
    %34 = math.sqrt %33 : vector<16x128xf32>
    %cst_10 = arith.constant 0.000000e+00 : f32
    %35 = vector.broadcast %cst_10 : f32 to vector<16x128xf32>
    %36 = arith.select %10, %34, %35 : vector<16x128xi1>, vector<16x128xf32>
    %cst_11 = arith.constant dense<0xFF800000> : vector<16xf32>
    %37 = vector.multi_reduction <maximumf>, %36, %cst_11 [1] : vector<16x128xf32> to vector<16xf32>
    %38 = vector.shape_cast %37 : vector<16xf32> to vector<16x1xf32>
    %cst_12 = arith.constant dense<0xFF800000> : vector<1xf32>
    %39 = vector.multi_reduction <maximumf>, %38, %cst_12 [0] : vector<16x1xf32> to vector<1xf32>
    %40 = vector.shape_cast %39 : vector<1xf32> to vector<1x1xf32>
    %cst_13 = arith.constant 1.000000e-30 : f32
    %41 = vector.broadcast %cst_13 : f32 to vector<1x1xf32>
    %42 = arith.maximumf %40, %41 : vector<1x1xf32>
    %43 = tpu.reciprocal %42 {approx = true} : vector<1x1xf32> -> vector<1x1xf32>
    %cst_14 = arith.constant 1.000000e+01 : f32
    %44 = vector.broadcast %cst_14 : f32 to vector<1x1xf32>
    %45 = arith.mulf %44, %43 : vector<1x1xf32>
    %46 = vector.broadcast %45 : vector<1x1xf32> to vector<16x128xf32>
    %47 = arith.mulf %36, %46 : vector<16x128xf32>
    %c0_15 = arith.constant 0 : index
    %48 = memref.load %arg0[%c0_15] : memref<1xf32, #tpu.memory_space<smem>>
    %cst_16 = arith.constant 0.000000e+00 : f32
    %49 = vector.broadcast %cst_16 : f32 to vector<16x1xf32>
    %cst_17 = arith.constant 0.000000e+00 : f32
    %50 = vector.broadcast %cst_17 : f32 to vector<1x128xf32>
    %c0_i32 = arith.constant 0 : i32
    %51 = vector.broadcast %49 : vector<16x1xf32> to vector<16x128xf32>
    %52 = arith.subf %51, %47 : vector<16x128xf32>
    %cst_18 = arith.constant 0xFF800000 : f32
    %53 = vector.shape_cast %7 : vector<16x1xi1> to vector<16x1xi1>
    %54 = vector.broadcast %53 : vector<16x1xi1> to vector<16x128xi1>
    %55 = vector.broadcast %cst_18 : f32 to vector<16x128xf32>
    %56 = arith.select %54, %52, %55 : vector<16x128xi1>, vector<16x128xf32>
    %cst_19 = arith.constant dense<0xFF800000> : vector<128xf32>
    %57 = vector.multi_reduction <maximumf>, %56, %cst_19 [0] : vector<16x128xf32> to vector<128xf32>
    %58 = vector.shape_cast %57 : vector<128xf32> to vector<1x128xf32>
    %59 = vector.broadcast %58 : vector<1x128xf32> to vector<16x128xf32>
    %60 = arith.subf %56, %59 : vector<16x128xf32>
    %61 = math.exp %60 : vector<16x128xf32>
    %cst_20 = arith.constant dense<0.000000e+00> : vector<128xf32>
    %62 = vector.multi_reduction <add>, %61, %cst_20 [0] : vector<16x128xf32> to vector<128xf32>
    %63 = vector.shape_cast %62 : vector<128xf32> to vector<1x128xf32>
    %64 = math.log %63 : vector<1x128xf32>
    %65 = arith.addf %64, %58 : vector<1x128xf32>
    %cst_21 = arith.constant -2.07944155 : f32
    %66 = vector.broadcast %cst_21 : f32 to vector<1x128xf32>
    %67 = arith.subf %66, %65 : vector<1x128xf32>
    %68 = vector.broadcast %67 : vector<1x128xf32> to vector<16x128xf32>
    %69 = arith.subf %68, %47 : vector<16x128xf32>
    %cst_22 = arith.constant 0xFF800000 : f32
    %70 = vector.shape_cast %4 : vector<1x128xi1> to vector<1x128xi1>
    %71 = vector.broadcast %70 : vector<1x128xi1> to vector<16x128xi1>
    %72 = vector.broadcast %cst_22 : f32 to vector<16x128xf32>
    %73 = arith.select %71, %69, %72 : vector<16x128xi1>, vector<16x128xf32>
    %cst_23 = arith.constant dense<0xFF800000> : vector<16xf32>
    %74 = vector.multi_reduction <maximumf>, %73, %cst_23 [1] : vector<16x128xf32> to vector<16xf32>
    %75 = vector.shape_cast %74 : vector<16xf32> to vector<16x1xf32>
    %76 = vector.broadcast %75 : vector<16x1xf32> to vector<16x128xf32>
    %77 = arith.subf %73, %76 : vector<16x128xf32>
    %78 = math.exp %77 : vector<16x128xf32>
    %cst_24 = arith.constant dense<0.000000e+00> : vector<16xf32>
    %79 = vector.multi_reduction <add>, %78, %cst_24 [1] : vector<16x128xf32> to vector<16xf32>
    %80 = vector.shape_cast %79 : vector<16xf32> to vector<16x1xf32>
    %81 = math.log %80 : vector<16x1xf32>
    %82 = arith.addf %81, %75 : vector<16x1xf32>
    %cst_25 = arith.constant -2.77258873 : f32
    %83 = vector.broadcast %cst_25 : f32 to vector<16x1xf32>
    %84 = arith.subf %83, %82 : vector<16x1xf32>
    %85 = vector.broadcast %48 : f32 to vector<16x1xf32>
    %86 = arith.mulf %85, %84 : vector<16x1xf32>
    %c1_i32 = arith.constant 1 : i32
    %87 = vector.broadcast %86 : vector<16x1xf32> to vector<16x128xf32>
    %88 = arith.subf %87, %47 : vector<16x128xf32>
    %cst_26 = arith.constant 0xFF800000 : f32
    %89 = vector.shape_cast %7 : vector<16x1xi1> to vector<16x1xi1>
    %90 = vector.broadcast %89 : vector<16x1xi1> to vector<16x128xi1>
    %91 = vector.broadcast %cst_26 : f32 to vector<16x128xf32>
    %92 = arith.select %90, %88, %91 : vector<16x128xi1>, vector<16x128xf32>
    %cst_27 = arith.constant dense<0xFF800000> : vector<128xf32>
    %93 = vector.multi_reduction <maximumf>, %92, %cst_27 [0] : vector<16x128xf32> to vector<128xf32>
    %94 = vector.shape_cast %93 : vector<128xf32> to vector<1x128xf32>
    %95 = vector.broadcast %94 : vector<1x128xf32> to vector<16x128xf32>
    %96 = arith.subf %92, %95 : vector<16x128xf32>
    %97 = math.exp %96 : vector<16x128xf32>
    %cst_28 = arith.constant dense<0.000000e+00> : vector<128xf32>
    %98 = vector.multi_reduction <add>, %97, %cst_28 [0] : vector<16x128xf32> to vector<128xf32>
    %99 = vector.shape_cast %98 : vector<128xf32> to vector<1x128xf32>
    %100 = math.log %99 : vector<1x128xf32>
    %101 = arith.addf %100, %94 : vector<1x128xf32>
    %cst_29 = arith.constant -2.07944155 : f32
    %102 = vector.broadcast %cst_29 : f32 to vector<1x128xf32>
    %103 = arith.subf %102, %101 : vector<1x128xf32>
    %104 = vector.broadcast %103 : vector<1x128xf32> to vector<16x128xf32>
    %105 = arith.subf %104, %47 : vector<16x128xf32>
    %cst_30 = arith.constant 0xFF800000 : f32
    %106 = vector.shape_cast %4 : vector<1x128xi1> to vector<1x128xi1>
    %107 = vector.broadcast %106 : vector<1x128xi1> to vector<16x128xi1>
    %108 = vector.broadcast %cst_30 : f32 to vector<16x128xf32>
    %109 = arith.select %107, %105, %108 : vector<16x128xi1>, vector<16x128xf32>
    %cst_31 = arith.constant dense<0xFF800000> : vector<16xf32>
    %110 = vector.multi_reduction <maximumf>, %109, %cst_31 [1] : vector<16x128xf32> to vector<16xf32>
    %111 = vector.shape_cast %110 : vector<16xf32> to vector<16x1xf32>
    %112 = vector.broadcast %111 : vector<16x1xf32> to vector<16x128xf32>
    %113 = arith.subf %109, %112 : vector<16x128xf32>
    %114 = math.exp %113 : vector<16x128xf32>
    %cst_32 = arith.constant dense<0.000000e+00> : vector<16xf32>
    %115 = vector.multi_reduction <add>, %114, %cst_32 [1] : vector<16x128xf32> to vector<16xf32>
    %116 = vector.shape_cast %115 : vector<16xf32> to vector<16x1xf32>
    %117 = math.log %116 : vector<16x1xf32>
    %118 = arith.addf %117, %111 : vector<16x1xf32>
    %cst_33 = arith.constant -2.77258873 : f32
    %119 = vector.broadcast %cst_33 : f32 to vector<16x1xf32>
    %120 = arith.subf %119, %118 : vector<16x1xf32>
    %121 = vector.broadcast %48 : f32 to vector<16x1xf32>
    %122 = arith.mulf %121, %120 : vector<16x1xf32>
    %c2_i32 = arith.constant 2 : i32
    %123 = vector.broadcast %122 : vector<16x1xf32> to vector<16x128xf32>
    %124 = arith.subf %123, %47 : vector<16x128xf32>
    %cst_34 = arith.constant 0xFF800000 : f32
    %125 = vector.shape_cast %7 : vector<16x1xi1> to vector<16x1xi1>
    %126 = vector.broadcast %125 : vector<16x1xi1> to vector<16x128xi1>
    %127 = vector.broadcast %cst_34 : f32 to vector<16x128xf32>
    %128 = arith.select %126, %124, %127 : vector<16x128xi1>, vector<16x128xf32>
    %cst_35 = arith.constant dense<0xFF800000> : vector<128xf32>
    %129 = vector.multi_reduction <maximumf>, %128, %cst_35 [0] : vector<16x128xf32> to vector<128xf32>
    %130 = vector.shape_cast %129 : vector<128xf32> to vector<1x128xf32>
    %131 = vector.broadcast %130 : vector<1x128xf32> to vector<16x128xf32>
    %132 = arith.subf %128, %131 : vector<16x128xf32>
    %133 = math.exp %132 : vector<16x128xf32>
    %cst_36 = arith.constant dense<0.000000e+00> : vector<128xf32>
    %134 = vector.multi_reduction <add>, %133, %cst_36 [0] : vector<16x128xf32> to vector<128xf32>
    %135 = vector.shape_cast %134 : vector<128xf32> to vector<1x128xf32>
    %136 = math.log %135 : vector<1x128xf32>
    %137 = arith.addf %136, %130 : vector<1x128xf32>
    %cst_37 = arith.constant -2.07944155 : f32
    %138 = vector.broadcast %cst_37 : f32 to vector<1x128xf32>
    %139 = arith.subf %138, %137 : vector<1x128xf32>
    %140 = vector.broadcast %139 : vector<1x128xf32> to vector<16x128xf32>
    %141 = arith.subf %140, %47 : vector<16x128xf32>
    %cst_38 = arith.constant 0xFF800000 : f32
    %142 = vector.shape_cast %4 : vector<1x128xi1> to vector<1x128xi1>
    %143 = vector.broadcast %142 : vector<1x128xi1> to vector<16x128xi1>
    %144 = vector.broadcast %cst_38 : f32 to vector<16x128xf32>
    %145 = arith.select %143, %141, %144 : vector<16x128xi1>, vector<16x128xf32>
    %cst_39 = arith.constant dense<0xFF800000> : vector<16xf32>
    %146 = vector.multi_reduction <maximumf>, %145, %cst_39 [1] : vector<16x128xf32> to vector<16xf32>
    %147 = vector.shape_cast %146 : vector<16xf32> to vector<16x1xf32>
    %148 = vector.broadcast %147 : vector<16x1xf32> to vector<16x128xf32>
    %149 = arith.subf %145, %148 : vector<16x128xf32>
    %150 = math.exp %149 : vector<16x128xf32>
    %cst_40 = arith.constant dense<0.000000e+00> : vector<16xf32>
    %151 = vector.multi_reduction <add>, %150, %cst_40 [1] : vector<16x128xf32> to vector<16xf32>
    %152 = vector.shape_cast %151 : vector<16xf32> to vector<16x1xf32>
    %153 = math.log %152 : vector<16x1xf32>
    %154 = arith.addf %153, %147 : vector<16x1xf32>
    %cst_41 = arith.constant -2.77258873 : f32
    %155 = vector.broadcast %cst_41 : f32 to vector<16x1xf32>
    %156 = arith.subf %155, %154 : vector<16x1xf32>
    %157 = vector.broadcast %48 : f32 to vector<16x1xf32>
    %158 = arith.mulf %157, %156 : vector<16x1xf32>
    %159 = vector.broadcast %158 : vector<16x1xf32> to vector<16x128xf32>
    %160 = vector.broadcast %139 : vector<1x128xf32> to vector<16x128xf32>
    %161 = arith.addf %159, %160 : vector<16x128xf32>
    %162 = arith.subf %161, %47 : vector<16x128xf32>
    %163 = math.exp %162 : vector<16x128xf32>
    %cst_42 = arith.constant 0.000000e+00 : f32
    %164 = vector.broadcast %cst_42 : f32 to vector<16x128xf32>
    %165 = arith.select %10, %163, %164 : vector<16x128xi1>, vector<16x128xf32>
    %c0_43 = arith.constant 0 : index
    %c0_44 = arith.constant 0 : index
    %166 = vector.load %arg3[%c0_43, %c0_44] : memref<16x128xf32, #tpu.memory_space<vmem>>, vector<16x128xf32>
    tpu.vector_store %arg3[%c0_43, %c0_44], %165 {strides = array<i32>} : memref<16x128xf32, #tpu.memory_space<vmem>>, vector<16x128xf32>,
    %167 = arith.mulf %47, %165 : vector<16x128xf32>
    %168 = vector.shape_cast %167 : vector<16x128xf32> to vector<1x16x128xf32>
    %cst_45 = arith.constant dense<0.000000e+00> : vector<1xf32>
    %169 = vector.multi_reduction <add>, %168, %cst_45 [1, 2] : vector<1x16x128xf32> to vector<1xf32>
    %170 = vector.shape_cast %169 : vector<1xf32> to vector<1x1x1xf32>
    %171 = vector.extract %170[0, 0, 0] : f32 from vector<1x1x1xf32>
    %cst_46 = arith.constant 1.000000e-01 : f32
    %172 = arith.mulf %cst_46, %171 : f32
    %c0_47 = arith.constant 0 : index
    %c0_48 = arith.constant 0 : index
    %173 = memref.load %arg4[%c0_47, %c0_48] : memref<1x1xf32, #tpu.memory_space<smem>>
    memref.store %172, %arg4[%c0_47, %c0_48] : memref<1x1xf32, #tpu.memory_space<smem>>
    return
  }
}

</mosaic_0001>

<bundles_post_ra>
// kernel: tpu_custom_call.1
= control target key start
LH: loop header
LB: loop body
LE: loop exit
PB: predicated region body
PF: predicated region fallthrough
CT: control target
= control target key end

     0   :  { %11 = vsyncpa [#allocation4], 0  ;;  %vm53_vm0 = vcmask 261120   ;;  %s1004_s0 = inlined_call_operand.<no memory space> [shape: f32[1], index: 0, kind: input, shape index: {}]   ;;  %s1005_s1 = inlined_call_operand.vmem [shape: f32[16,32], index: 1, kind: input, shape index: {}]   ;;  %s1006_s2 = inlined_call_operand.vmem [shape: f32[128,32], index: 2, kind: input, shape index: {}]   ;;  %s1007_s3 = inlined_call_operand.hbm [shape: f32[16,128], index: 3, kind: output, shape index: {0}]   ;;  %s1008_s4 = inlined_call_operand.hbm [shape: f32[1,1], index: 4, kind: output, shape index: {1}]  }
   0x1   :  { %v36_v0 = vld [vmem:[%s1006_s2 + $0x78] sm:$0xff]  ;;  %v765_v1 = vld [vmem:[%s1006_s2 + $0x68] sm:$0xff]  ;;  %v35_v6 = vld [vmem:[%s1006_s2 + $0x70] sm:$0xff] }
   0x2   :  { %v107_v2 = vsel %vm53_vm0, %v36_v0, inf  ;;  %v101_v3 = vsel %vm53_vm0, %v765_v1, inf  ;;  %v773_v4 = vld [vmem:[%s1006_s2 + $0x58] sm:$0xff]  ;;  %v33_v7 = vld [vmem:[%s1006_s2 + $0x60] sm:$0xff]  ;;  %v786_v8 = vld [vmem:[%s1006_s2 + $0x50] sm:$0xff] }
   0x3   :  { %108 = vmin.xlane.f32.xlu0 %v107_v2  ;;  %102 = vmin.xlane.f32.xlu1 %v101_v3  ;;  %v95_v5 = vsel %vm53_vm0, %v773_v4, inf }
   0x4   :  { %96 = vmin.xlane.f32.xlu2 %v95_v5 }
   0x5   :  { %12 = vsyncpa [#allocation5], 0  ;;  %v104_v9 = vsel %vm53_vm0, %v35_v6, inf  ;;  %v98_v10 = vsel %vm53_vm0, %v33_v7, inf  ;;  %v92_v11 = vsel %vm53_vm0, %v786_v8, inf  ;;  %v795_v12 = vld [vmem:[%s1006_s2 + $0x48] sm:$0xff] }
   0x6   :  { %v800_v13 = vld [vmem:[%s1006_s2 + $0x40] sm:$0xff]  ;;  %v805_v14 = vld [vmem:[%s1006_s2 + $0x38] sm:$0xff]  ;;  %v89_v15 = vsel %vm53_vm0, %v795_v12, inf  ;;  %v816_v18 = vld [vmem:[%s1006_s2 + $0x30] sm:$0xff]  ;;  %s552_s28 = sshll.u32 %s1007_s3, 4  ;;  %s731_s29 = smov 128   ;;  %s553_s28 = int_to_ptr.hbm [resolvable:$true] %s552_s28 }
   0x7   :  { %v86_v16 = vsel %vm53_vm0, %v800_v13, inf  ;;  %v83_v17 = vsel %vm53_vm0, %v805_v14, inf  ;;  %v821_v19 = vld [vmem:[%s1006_s2 + $0x28] sm:$0xff]  ;;  %v826_v20 = vld [vmem:[%s1006_s2 + $0x20] sm:$0xff]  ;;  %v80_v21 = vsel %vm53_vm0, %v816_v18, inf  ;;  %v837_v24 = vld [vmem:[%s1006_s2 + $0x18] sm:$0xff] }
   0x8   :  { %v77_v22 = vsel %vm53_vm0, %v821_v19, inf  ;;  %v74_v23 = vsel %vm53_vm0, %v826_v20, inf  ;;  %v842_v25 = vld [vmem:[%s1006_s2 + $0x10] sm:$0xff]  ;;  %v847_v26 = vld [vmem:[%s1006_s2 + $0x8] sm:$0xff]  ;;  %v71_v27 = vsel %vm53_vm0, %v837_v24, inf  ;;  %v858_v30 = vld [vmem:[%s1006_s2] sm:$0xff] }
   0x9   :  { %v68_v28 = vsel %vm53_vm0, %v842_v25, inf  ;;  %v65_v29 = vsel %vm53_vm0, %v847_v26, inf  ;;  %v863_v31 = vld [vmem:[%s1005_s1 + $0x8] sm:$0xff]  ;;  %v868_v32 = vld [vmem:[%s1005_s1] sm:$0xff]  ;;  %v62_v33 = vsel %vm53_vm0, %v858_v30, inf  ;;  %s732_s30 = smov 8  }
   0xa   :  { %v57_v34 = vsel %vm53_vm0, %v863_v31, inf  ;;  %v54_v35 = vsel %vm53_vm0, %v868_v32, inf  ;;  %s564_s7 = sshll.u32 %s1008_s4, 4  ;;  %s733_s3 = smov [#allocation6]   ;;  %s565_s7 = int_to_ptr.hbm [resolvable:$true] %s564_s7 }
   0xb   :  { %105 = vmin.xlane.f32.xlu0 %v104_v9  ;;  %99 = vmin.xlane.f32.xlu1 %v98_v10 }
   0xc   :  { %93 = vmin.xlane.f32.xlu2 %v92_v11 }
  0x13   :  { %90 = vmin.xlane.f32.xlu0 %v89_v15  ;;  %87 = vmin.xlane.f32.xlu1 %v86_v16 }
  0x14   :  { %84 = vmin.xlane.f32.xlu2 %v83_v17 }
  0x1b   :  { %81 = vmin.xlane.f32.xlu0 %v80_v21  ;;  %78 = vmin.xlane.f32.xlu1 %v77_v22 }
  0x1c   :  { %75 = vmin.xlane.f32.xlu2 %v74_v23 }
  0x23   :  { %72 = vmin.xlane.f32.xlu0 %v71_v27  ;;  %69 = vmin.xlane.f32.xlu1 %v68_v28 }
  0x24   :  { %66 = vmin.xlane.f32.xlu2 %v65_v29 }
  0x2b   :  { %63 = vmin.xlane.f32.xlu0 %v62_v33  ;;  %58 = vmin.xlane.f32.xlu1 %v57_v34 }
  0x2c   :  { %55 = vmin.xlane.f32.xlu2 %v54_v35 }
  0x76   :  { %v109_v36 = vpop.xlane.xlu0 %108  ;;  %v103_v37 = vpop.xlane.xlu1 %102 }
  0x77   :  { %v125_v38 = vsub.f32 %v36_v0, %v109_v36  ;;  %v97_v39 = vpop.xlane.xlu2 %96  ;;  %v123_v45 = vsub.f32 %v765_v1, %v103_v37 }
  0x78   :  { %v121_v52 = vsub.f32 %v773_v4, %v97_v39 }
  0x79   :  { %596 = vmatpush.xpose.msk.msra.mxu1 %vm53_vm0, %v125_v38  ;;  %614 = vmatpush.xpose.msk.msra.mxu2 %vm53_vm0, %v125_v38  ;;  %v149_v40 = vmul.f32 %v125_v38, %v125_v38  ;;  %v147_v48 = vmul.f32 %v123_v45, %v123_v45 }
  0x7a   :  { %v145_v55 = vmul.f32 %v121_v52, %v121_v52 }
  0x7b   :  { %579 = vmatpush.xpose.msk.msra.mxu0 %vm53_vm0, %v149_v40 }
  0x7e   :  { %v106_v41 = vpop.xlane.xlu0 %105  ;;  %v100_v42 = vpop.xlane.xlu1 %99 }
  0x7f   :  { %v124_v43 = vsub.f32 %v35_v6, %v106_v41  ;;  %v94_v44 = vpop.xlane.xlu2 %93  ;;  %v122_v47 = vsub.f32 %v33_v7, %v100_v42 }
  0x80   :  { %v120_v53 = vsub.f32 %v786_v8, %v94_v44 }
  0x81   :  { %597 = vmatpush.xpose.msk.msra.mxu1 %vm53_vm0, %v124_v43  ;;  %615 = vmatpush.xpose.msk.msra.mxu2 %vm53_vm0, %v124_v43  ;;  %v148_v46 = vmul.f32 %v124_v43, %v124_v43  ;;  %v146_v50 = vmul.f32 %v122_v47, %v122_v47 }
  0x82   :  { %v144_v58 = vmul.f32 %v120_v53, %v120_v53 }
  0x83   :  { %580 = vmatpush.xpose.msk.msra.mxu0 %vm53_vm0, %v148_v46 }
  0x85   :  { %598 = vmatpush.xpose.msk.msra.mxu1 %vm53_vm0, %v123_v45  ;;  %616 = vmatpush.xpose.msk.msra.mxu2 %vm53_vm0, %v123_v45 }
  0x86   :  { %v88_v49 = vpop.xlane.xlu1 %87  ;;  %v91_v54 = vpop.xlane.xlu0 %90 }
  0x87   :  { %581 = vmatpush.xpose.msk.msra.mxu0 %vm53_vm0, %v147_v48  ;;  %v85_v51 = vpop.xlane.xlu2 %84  ;;  %v119_v57 = vsub.f32 %v795_v12, %v91_v54  ;;  %v118_v60 = vsub.f32 %v800_v13, %v88_v49  ;;  %v37_v48 = vlaneseq }
  0x88   :  { %v117_v63 = vsub.f32 %v805_v14, %v85_v51 }
  0x89   :  { %599 = vmatpush.xpose.msk.msra.mxu1 %vm53_vm0, %v122_v47  ;;  %617 = vmatpush.xpose.msk.msra.mxu2 %vm53_vm0, %v122_v47  ;;  %v143_v61 = vmul.f32 %v119_v57, %v119_v57  ;;  %v142_v0 = vmul.f32 %v118_v60, %v118_v60 }
  0x8a   :  { %v141_v4 = vmul.f32 %v117_v63, %v117_v63 }
  0x8b   :  { %582 = vmatpush.xpose.msk.msra.mxu0 %vm53_vm0, %v146_v50 }
  0x8d   :  { %600 = vmatpush.xpose.msk.msra.mxu1 %vm53_vm0, %v121_v52  ;;  %618 = vmatpush.xpose.msk.msra.mxu2 %vm53_vm0, %v121_v52 }
  0x8e   :  { %v79_v56 = vpop.xlane.xlu1 %78  ;;  %v82_v2 = vpop.xlane.xlu0 %81 }
  0x8f   :  { %583 = vmatpush.xpose.msk.msra.mxu0 %vm53_vm0, %v145_v55  ;;  %v76_v59 = vpop.xlane.xlu2 %75  ;;  %v116_v3 = vsub.f32 %v816_v18, %v82_v2  ;;  %v115_v6 = vsub.f32 %v821_v19, %v79_v56 }
  0x90   :  { %v114_v13 = vsub.f32 %v826_v20, %v76_v59 }
  0x91   :  { %601 = vmatpush.xpose.msk.msra.mxu1 %vm53_vm0, %v120_v53  ;;  %619 = vmatpush.xpose.msk.msra.mxu2 %vm53_vm0, %v120_v53  ;;  %v140_v7 = vmul.f32 %v116_v3, %v116_v3  ;;  %v139_v14 = vmul.f32 %v115_v6, %v115_v6  ;;  %v944_v53 = vand.u32 127, %v37_v48 }
  0x92   :  { %v138_v19 = vmul.f32 %v114_v13, %v114_v13 }
  0x93   :  { %584 = vmatpush.xpose.msk.msra.mxu0 %vm53_vm0, %v144_v58  ;;  %vm39_vm1 = vcmp.lt.s32.totalorder %v944_v53, 8 }
  0x95   :  { %602 = vmatpush.xpose.msk.msra.mxu1 %vm53_vm0, %v119_v57  ;;  %620 = vmatpush.xpose.msk.msra.mxu2 %vm53_vm0, %v119_v57 }
  0x96   :  { %v70_v62 = vpop.xlane.xlu1 %69  ;;  %v73_v16 = vpop.xlane.xlu0 %72 }
  0x97   :  { %585 = vmatpush.xpose.msk.msra.mxu0 %vm53_vm0, %v143_v61  ;;  %v67_v1 = vpop.xlane.xlu2 %66  ;;  %v113_v18 = vsub.f32 %v837_v24, %v73_v16  ;;  %v112_v20 = vsub.f32 %v842_v25, %v70_v62 }
  0x98   :  { %v111_v22 = vsub.f32 %v847_v26, %v67_v1  ;;  %v729_v26 = vmov 1.0  }
  0x99   :  { %603 = vmatpush.xpose.msk.msra.mxu1 %vm53_vm0, %v118_v60  ;;  %621 = vmatpush.xpose.msk.msra.mxu2 %vm53_vm0, %v118_v60  ;;  %v137_v21 = vmul.f32 %v113_v18, %v113_v18  ;;  %v136_v23 = vmul.f32 %v112_v20, %v112_v20 }
  0x9a   :  { %v135_v25 = vmul.f32 %v111_v22, %v111_v22 }
  0x9b   :  { %586 = vmatpush.xpose.msk.msra.mxu0 %vm53_vm0, %v142_v0 }
  0x9d   :  { %604 = vmatpush.xpose.msk.msra.mxu1 %vm53_vm0, %v117_v63  ;;  %622 = vmatpush.xpose.msk.msra.mxu2 %vm53_vm0, %v117_v63 }
  0x9e   :  { %v59_v5 = vpop.xlane.xlu1 %58  ;;  %v64_v24 = vpop.xlane.xlu0 %63 }
  0x9f   :  { %587 = vmatpush.xpose.msk.msra.mxu0 %vm53_vm0, %v141_v4  ;;  %v61_v8 = vsub.f32 %v863_v31, %v59_v5  ;;  %v56_v9 = vpop.xlane.xlu2 %55  ;;  %v110_v27 = vsub.f32 %v858_v30, %v64_v24 }
  0xa0   :  { %v60_v10 = vsub.f32 %v868_v32, %v56_v9 }
  0xa1   :  { %605 = vmatpush.xpose.msk.msra.mxu1 %vm53_vm0, %v116_v3  ;;  %623 = vmatpush.xpose.msk.msra.mxu2 %vm53_vm0, %v116_v3  ;;  %v127_v11 = vmul.f32 %v61_v8, %v61_v8  ;;  %v134_v28 = vmul.f32 %v110_v27, %v110_v27 }
  0xa2   :  { %v126_v12 = vmul.f32 %v60_v10, %v60_v10 }
  0xa3   :  { %588 = vmatpush.xpose.msk.msra.mxu0 %vm53_vm0, %v140_v7  ;;  %v131_v15 = vsel %vm53_vm0, %v127_v11, 0.0 }
  0xa4   :  { %132 = vadd.xlane.f32.xlu1 %v131_v15  ;;  %v128_v17 = vsel %vm53_vm0, %v126_v12, 0.0 }
  0xa5   :  { %606 = vmatpush.xpose.msk.msra.mxu1 %vm53_vm0, %v115_v6  ;;  %624 = vmatpush.xpose.msk.msra.mxu2 %vm53_vm0, %v115_v6 }
  0xa6   :  { %129 = vadd.xlane.f32.xlu0 %v128_v17 }
  0xa7   :  { %589 = vmatpush.xpose.msk.msra.mxu0 %vm53_vm0, %v139_v14 }
  0xa9   :  { %607 = vmatpush.xpose.msk.msra.mxu1 %vm53_vm0, %v114_v13  ;;  %625 = vmatpush.xpose.msk.msra.mxu2 %vm53_vm0, %v114_v13 }
  0xab   :  { %590 = vmatpush.xpose.msk.msra.mxu0 %vm53_vm0, %v138_v19 }
  0xad   :  { %608 = vmatpush.xpose.msk.msra.mxu1 %vm53_vm0, %v113_v18  ;;  %626 = vmatpush.xpose.msk.msra.mxu2 %vm53_vm0, %v113_v18 }
  0xaf   :  { %591 = vmatpush.xpose.msk.msra.mxu0 %vm53_vm0, %v137_v21 }
  0xb1   :  { %609 = vmatpush.xpose.msk.msra.mxu1 %vm53_vm0, %v112_v20  ;;  %627 = vmatpush.xpose.msk.msra.mxu2 %vm53_vm0, %v112_v20 }
  0xb3   :  { %592 = vmatpush.xpose.msk.msra.mxu0 %vm53_vm0, %v136_v23 }
  0xb5   :  { %610 = vmatpush.xpose.msk.msra.mxu1 %vm53_vm0, %v111_v22  ;;  %628 = vmatpush.xpose.msk.msra.mxu2 %vm53_vm0, %v111_v22 }
  0xb7   :  { %593 = vmatpush.xpose.msk.msra.mxu0 %vm53_vm0, %v135_v25 }
  0xb9   :  { %611 = vmatpush.xpose.msk.msra.mxu1 %vm53_vm0, %v110_v27  ;;  %629 = vmatpush.xpose.msk.msra.mxu2 %vm53_vm0, %v110_v27 }
  0xbb   :  { %594 = vmatpush.xpose.msk.msra.mxu0 %vm53_vm0, %v134_v28 }
  0xbc   :  { %613 = vmatmul.msk.f32.vlgmr.msra.gmra.mxu2 %vm53_vm0, %v61_v8  ;;  %612 = vmatmul.msk.f32.vlgmr.msra.gmra.mxu1 %vm53_vm0, %v60_v10 }
  0xbe   :  { %595 = vmatmul.msk.f32.vlgmr.msra.gmra.mxu0 %vm53_vm0, %v729_v26 }
 0x117   :  { %v133_v35 = vpop.xlane.xlu1 %132 }
 0x119   :  { %v130_v33 = vpop.xlane.xlu0 %129 }
 0x139   :  { %v292_v29 = vpop.f32.mrf.mxu1 }
 0x13a   :  { %v301_v32 = vmul.f32 2.0, %v292_v29 }
 0x13b   :  { %v218_v30 = vpop.f32.mrf.mxu0 }
 0x13c   :  { %v298_v31 = vperm.slane %v218_v30, 0 }
 0x13e   :  { %v299_v34 = vadd.f32 %v298_v31, %v130_v33  ;;  %v300_v37 = vadd.f32 %v298_v31, %v133_v35 }
 0x13f   :  { %v295_v36 = vpop.f32.mrf.mxu2 }
 0x140   :  { %v303_v38 = vsub.f32 %v299_v34, %v301_v32  ;;  %v302_v39 = vmul.f32 2.0, %v295_v36 }
 0x142   :  { %v305_v40 = vmax.f32 %v303_v38, 0.0  ;;  %v304_v41 = vsub.f32 %v300_v37, %v302_v39 }
 0x144   :  { %v306_v42 = vmax.f32 %v304_v41, 0.0  ;;  %637 = vrsqrt.f32 %v305_v40  ;;  %vm314_vm2 = vcmp.eq.f32.partialorder %v305_v40, inf  ;;  %v317_v58 = vand.u32 2147483648, %v305_v40 }
 0x145   :  { %vm316_vm3 = vcmp.eq.f32.partialorder %v305_v40, 0.0 }
 0x146   :  { %639 = vrsqrt.f32 %v306_v42  ;;  %vm326_vm4 = vcmp.eq.f32.partialorder %v306_v42, inf  ;;  %v329_v62 = vand.u32 2147483648, %v306_v42  ;;  %vm328_vm5 = vcmp.eq.f32.partialorder %v306_v42, 0.0 }
 0x14a   :  { %v638_v43 = vpop.eup %637 }
 0x14b   :  { %v308_v44 = vmul.f32 %v638_v43, %v305_v40 }
 0x14c   :  { %v640_v45 = vpop.eup %639 }
 0x14d   :  { %v309_v46 = vmul.f32 %v638_v43, %v308_v44  ;;  %v320_v47 = vmul.f32 %v640_v45, %v306_v42 }
 0x14f   :  { %v310_v49 = vmul.f32 0.5, %v309_v46  ;;  %v321_v50 = vmul.f32 %v640_v45, %v320_v47 }
 0x151   :  { %v311_v51 = vsub.f32 1.5, %v310_v49  ;;  %v322_v52 = vmul.f32 0.5, %v321_v50 }
 0x153   :  { %v312_v54 = vmul.f32 %v638_v43, %v311_v51  ;;  %v323_v55 = vsub.f32 1.5, %v322_v52 }
 0x155   :  { %v313_v56 = vmul.f32 %v312_v54, %v305_v40  ;;  %v324_v57 = vmul.f32 %v640_v45, %v323_v55 }
 0x157   :  { %v315_v59 = vsel %vm314_vm2, %v305_v40, %v313_v56  ;;  %v325_v60 = vmul.f32 %v324_v57, %v306_v42 }
 0x158   :  { %v318_v61 = vsel %vm316_vm3, %v317_v58, %v315_v59 }
 0x159   :  { %v331_v63 = vsel %vm39_vm1, %v318_v61, 0.0  ;;  %v327_v0 = vsel %vm326_vm4, %v306_v42, %v325_v60 }
 0x15a   :  { %333 = vmax.xlane.f32.xlu2 %v331_v63  ;;  %v330_v1 = vsel %vm328_vm5, %v329_v62, %v327_v0 }
 0x15b   :  { %v332_v2 = vsel %vm39_vm1, %v330_v1, 0.0 }
 0x15c   :  { %335 = vmax.xlane.f32.xlu0 %v332_v2 }
 0x1cd   :  { %v334_v3 = vpop.xlane.xlu2 %333 }
 0x1cf   :  { %v336_v4 = vpop.xlane.xlu0 %335 }
 0x1d0   :  { %v337_v5 = vmax.f32 %v334_v3, %v336_v4 }
 0x1d2   :  { %v338_v6 = vrot.slane %v337_v5, 4 }
 0x1d4   :  { %v339_v7 = vmax.f32 %v337_v5, %v338_v6 }
 0x1d6   :  { %v340_v8 = vrot.slane %v339_v7, 2 }
 0x1d8   :  { %v341_v9 = vmax.f32 %v339_v7, %v340_v8 }
 0x1da   :  { %v342_v10 = vrot.slane %v341_v9, 1 }
 0x1dc   :  { %v343_v11 = vmax.f32 %v341_v9, %v342_v10 }
 0x1de   :  { %v344_v12 = vmax.f32 %v343_v11, 1e-30 }
 0x1e0   :  { %641 = vrcp.f32 %v344_v12 }
 0x1e6   :  { %v642_v13 = vpop.eup %641 }
 0x1e7   :  { %v346_v14 = vmul.f32 10.0, %v642_v13 }
 0x1e9   :  { %v951_v15 = vmul.f32 %v346_v14, %v331_v63  ;;  %v953_v16 = vmul.f32 %v346_v14, %v332_v2  ;;  %v966_v63 = vstv %s1004_s0  ;;  %s730_s0 = smov [#allocation3]  }
 0x1ea   :  { %s550_s25 = sshll.u32 %s730_s0, 4  ;;  %s551_s25 = int_to_ptr.vmem [resolvable:$true] %s550_s25 }
 0x1eb   :  { %v350_v17 = vsub.f32 0.0, %v951_v15  ;;  %v351_v18 = vsub.f32 0.0, %v953_v16 }
 0x1ed   :  { %v354_v19 = vmax.f32 %v350_v17, %v351_v18 }
 0x1ef   :  { %v355_v20 = vrot.slane %v354_v19, 4 }
 0x1f1   :  { %v356_v21 = vmax.f32 %v354_v19, %v355_v20 }
 0x1f3   :  { %v357_v22 = vrot.slane %v356_v21, 2 }
 0x1f5   :  { %v358_v23 = vmax.f32 %v356_v21, %v357_v22 }
 0x1f7   :  { %v359_v24 = vrot.slane %v358_v23, 1 }
 0x1f9   :  { %v360_v27 = vmax.f32 %v358_v23, %v359_v24 }
 0x1fb   :  { %v361_v25 = vsub.f32 %v350_v17, %v360_v27  ;;  %v362_v28 = vsub.f32 %v351_v18, %v360_v27 }
 0x1fd   :  { %v363_v26 = vmul.f32 1.442695, %v361_v25  ;;  %v365_v29 = vmul.f32 1.442695, %v362_v28 }
 0x1ff   :  { %643 = vpow2.f32 %v363_v26 }
 0x200   :  { %645 = vpow2.f32 %v365_v29 }
 0x205   :  { %v644_v30 = vpop.eup %643 }
 0x206   :  { %v646_v31 = vpop.eup %645 }
 0x207   :  { %v367_v32 = vadd.f32 %v646_v31, %v644_v30 }
 0x209   :  { %v368_v33 = vrot.slane %v367_v32, 4 }
 0x20b   :  { %v369_v34 = vadd.f32 %v368_v33, %v367_v32 }
 0x20d   :  { %v370_v35 = vrot.slane %v369_v34, 2 }
 0x20f   :  { %v371_v36 = vadd.f32 %v370_v35, %v369_v34 }
 0x211   :  { %v372_v37 = vrot.slane %v371_v36, 1 }
 0x213   :  { %v373_v38 = vadd.f32 %v372_v37, %v371_v36 }
 0x215   :  { %647 = vlog2.f32 %v373_v38 }
 0x21b   :  { %v648_v39 = vpop.eup %647 }
 0x21c   :  { %v375_v40 = vmul.f32 0.6931472, %v648_v39 }
 0x21e   :  { %v376_v41 = vadd.f32 %v375_v40, %v360_v27 }
 0x220   :  { %v377_v42 = vsub.f32 -2.0794415, %v376_v41 }
 0x222   :  { %v379_v43 = vsub.f32 %v377_v42, %v953_v16  ;;  %v378_v44 = vsub.f32 %v377_v42, %v951_v15 }
 0x224   :  { %v381_v45 = vsel %vm39_vm1, %v379_v43, -inf  ;;  %v380_v46 = vsel %vm39_vm1, %v378_v44, -inf }
 0x225   :  { %384 = vmax.xlane.f32.xlu2 %v381_v45  ;;  %382 = vmax.xlane.f32.xlu1 %v380_v46 }
 0x298   :  { %v385_v47 = vpop.xlane.xlu2 %384  ;;  %v383_v48 = vpop.xlane.xlu1 %382 }
 0x299   :  { %v387_v49 = vsub.f32 %v381_v45, %v385_v47  ;;  %v386_v50 = vsub.f32 %v380_v46, %v383_v48 }
 0x29b   :  { %v390_v51 = vmul.f32 1.442695, %v387_v49  ;;  %v388_v52 = vmul.f32 1.442695, %v386_v50 }
 0x29d   :  { %649 = vpow2.f32 %v390_v51 }
 0x29e   :  { %651 = vpow2.f32 %v388_v52 }
 0x2a3   :  { %v650_v54 = vpop.eup %649 }
 0x2a4   :  { %v652_v55 = vpop.eup %651  ;;  %394 = vadd.xlane.f32.xlu1 %v650_v54 }
 0x2a5   :  { %392 = vadd.xlane.f32.xlu0 %v652_v55 }
 0x317   :  { %v395_v56 = vpop.xlane.xlu1 %394 }
 0x318   :  { %v393_v57 = vpop.xlane.xlu0 %392  ;;  %653 = vlog2.f32 %v395_v56 }
 0x319   :  { %655 = vlog2.f32 %v393_v57 }
 0x31e   :  { %v654_v58 = vpop.eup %653 }
 0x31f   :  { %v656_v59 = vpop.eup %655  ;;  %v399_v60 = vmul.f32 0.6931472, %v654_v58 }
 0x320   :  { %v397_v61 = vmul.f32 0.6931472, %v656_v59 }
 0x321   :  { %v401_v62 = vadd.f32 %v399_v60, %v385_v47 }
 0x322   :  { %v400_v0 = vadd.f32 %v397_v61, %v383_v48 }
 0x323   :  { %v403_v1 = vsub.f32 -2.7725887, %v401_v62 }
 0x324   :  { %v402_v2 = vsub.f32 -2.7725887, %v400_v0 }
 0x325   :  { %v406_v3 = vmul.f32 %v966_v63, %v403_v1 }
 0x326   :  { %v405_v4 = vmul.f32 %v966_v63, %v402_v2 }
 0x327   :  { %v408_v5 = vsub.f32 %v406_v3, %v953_v16 }
 0x328   :  { %v407_v6 = vsub.f32 %v405_v4, %v951_v15 }
 0x32a   :  { %v411_v7 = vmax.f32 %v407_v6, %v408_v5 }
 0x32c   :  { %v412_v8 = vrot.slane %v411_v7, 4 }
 0x32e   :  { %v413_v9 = vmax.f32 %v411_v7, %v412_v8 }
 0x330   :  { %v414_v10 = vrot.slane %v413_v9, 2 }
 0x332   :  { %v415_v11 = vmax.f32 %v413_v9, %v414_v10 }
 0x334   :  { %v416_v12 = vrot.slane %v415_v11, 1 }
 0x336   :  { %v417_v13 = vmax.f32 %v415_v11, %v416_v12 }
 0x338   :  { %v418_v14 = vsub.f32 %v407_v6, %v417_v13  ;;  %v419_v17 = vsub.f32 %v408_v5, %v417_v13 }
 0x33a   :  { %v420_v18 = vmul.f32 1.442695, %v418_v14  ;;  %v422_v19 = vmul.f32 1.442695, %v419_v17 }
 0x33c   :  { %657 = vpow2.f32 %v420_v18 }
 0x33d   :  { %659 = vpow2.f32 %v422_v19 }
 0x342   :  { %v658_v20 = vpop.eup %657 }
 0x343   :  { %v660_v21 = vpop.eup %659 }
 0x344   :  { %v424_v22 = vadd.f32 %v660_v21, %v658_v20 }
 0x346   :  { %v425_v23 = vrot.slane %v424_v22, 4 }
 0x348   :  { %v426_v24 = vadd.f32 %v425_v23, %v424_v22 }
 0x34a   :  { %v427_v27 = vrot.slane %v426_v24, 2 }
 0x34c   :  { %v428_v25 = vadd.f32 %v427_v27, %v426_v24 }
 0x34e   :  { %v429_v28 = vrot.slane %v428_v25, 1 }
 0x350   :  { %v430_v26 = vadd.f32 %v429_v28, %v428_v25 }
 0x352   :  { %661 = vlog2.f32 %v430_v26 }
 0x358   :  { %v662_v29 = vpop.eup %661 }
 0x359   :  { %v432_v30 = vmul.f32 0.6931472, %v662_v29 }
 0x35b   :  { %v433_v31 = vadd.f32 %v432_v30, %v417_v13 }
 0x35d   :  { %v434_v32 = vsub.f32 -2.0794415, %v433_v31 }
 0x35f   :  { %v436_v33 = vsub.f32 %v434_v32, %v953_v16  ;;  %v435_v34 = vsub.f32 %v434_v32, %v951_v15 }
 0x361   :  { %v438_v35 = vsel %vm39_vm1, %v436_v33, -inf  ;;  %v437_v36 = vsel %vm39_vm1, %v435_v34, -inf }
 0x362   :  { %441 = vmax.xlane.f32.xlu0 %v438_v35  ;;  %439 = vmax.xlane.f32.xlu2 %v437_v36 }
 0x3d5   :  { %v442_v37 = vpop.xlane.xlu0 %441  ;;  %v440_v38 = vpop.xlane.xlu2 %439 }
 0x3d6   :  { %v444_v39 = vsub.f32 %v438_v35, %v442_v37  ;;  %v443_v40 = vsub.f32 %v437_v36, %v440_v38 }
 0x3d8   :  { %v447_v41 = vmul.f32 1.442695, %v444_v39  ;;  %v445_v42 = vmul.f32 1.442695, %v443_v40 }
 0x3da   :  { %663 = vpow2.f32 %v447_v41 }
 0x3db   :  { %665 = vpow2.f32 %v445_v42 }
 0x3e0   :  { %v664_v43 = vpop.eup %663 }
 0x3e1   :  { %v666_v44 = vpop.eup %665  ;;  %451 = vadd.xlane.f32.xlu2 %v664_v43 }
 0x3e2   :  { %449 = vadd.xlane.f32.xlu1 %v666_v44 }
 0x454   :  { %v452_v45 = vpop.xlane.xlu2 %451 }
 0x455   :  { %v450_v46 = vpop.xlane.xlu1 %449  ;;  %667 = vlog2.f32 %v452_v45 }
 0x456   :  { %669 = vlog2.f32 %v450_v46 }
 0x45b   :  { %v668_v47 = vpop.eup %667 }
 0x45c   :  { %v670_v48 = vpop.eup %669  ;;  %v456_v49 = vmul.f32 0.6931472, %v668_v47 }
 0x45d   :  { %v454_v50 = vmul.f32 0.6931472, %v670_v48 }
 0x45e   :  { %v458_v51 = vadd.f32 %v456_v49, %v442_v37 }
 0x45f   :  { %v457_v52 = vadd.f32 %v454_v50, %v440_v38 }
 0x460   :  { %v460_v54 = vsub.f32 -2.7725887, %v458_v51 }
 0x461   :  { %v459_v55 = vsub.f32 -2.7725887, %v457_v52 }
 0x462   :  { %v462_v56 = vmul.f32 %v460_v54, %v966_v63 }
 0x463   :  { %v461_v57 = vmul.f32 %v459_v55, %v966_v63 }
 0x464   :  { %v464_v58 = vsub.f32 %v462_v56, %v953_v16 }
 0x465   :  { %v463_v59 = vsub.f32 %v461_v57, %v951_v15 }
 0x467   :  { %v467_v60 = vmax.f32 %v463_v59, %v464_v58 }
 0x469   :  { %v468_v61 = vrot.slane %v467_v60, 4 }
 0x46b   :  { %v469_v62 = vmax.f32 %v467_v60, %v468_v61 }
 0x46d   :  { %v470_v0 = vrot.slane %v469_v62, 2 }
 0x46f   :  { %v471_v1 = vmax.f32 %v469_v62, %v470_v0 }
 0x471   :  { %v472_v2 = vrot.slane %v471_v1, 1 }
 0x473   :  { %v473_v3 = vmax.f32 %v471_v1, %v472_v2 }
 0x475   :  { %v474_v4 = vsub.f32 %v463_v59, %v473_v3  ;;  %v475_v5 = vsub.f32 %v464_v58, %v473_v3 }
 0x477   :  { %v476_v6 = vmul.f32 1.442695, %v474_v4  ;;  %v478_v7 = vmul.f32 1.442695, %v475_v5 }
 0x479   :  { %671 = vpow2.f32 %v476_v6 }
 0x47a   :  { %673 = vpow2.f32 %v478_v7 }
 0x47f   :  { %v672_v8 = vpop.eup %671 }
 0x480   :  { %v674_v9 = vpop.eup %673 }
 0x481   :  { %v480_v10 = vadd.f32 %v674_v9, %v672_v8 }
 0x483   :  { %v481_v11 = vrot.slane %v480_v10, 4 }
 0x485   :  { %v482_v12 = vadd.f32 %v481_v11, %v480_v10 }
 0x487   :  { %v483_v13 = vrot.slane %v482_v12, 2 }
 0x489   :  { %v484_v14 = vadd.f32 %v483_v13, %v482_v12 }
 0x48b   :  { %v485_v17 = vrot.slane %v484_v14, 1 }
 0x48d   :  { %v486_v18 = vadd.f32 %v485_v17, %v484_v14 }
 0x48f   :  { %675 = vlog2.f32 %v486_v18 }
 0x495   :  { %v676_v19 = vpop.eup %675 }
 0x496   :  { %v488_v20 = vmul.f32 0.6931472, %v676_v19 }
 0x498   :  { %v489_v21 = vadd.f32 %v488_v20, %v473_v3 }
 0x49a   :  { %v490_v22 = vsub.f32 -2.0794415, %v489_v21 }
 0x49c   :  { %v492_v23 = vsub.f32 %v490_v22, %v953_v16  ;;  %v491_v24 = vsub.f32 %v490_v22, %v951_v15 }
 0x49e   :  { %v494_v27 = vsel %vm39_vm1, %v492_v23, -inf  ;;  %v493_v25 = vsel %vm39_vm1, %v491_v24, -inf }
 0x49f   :  { %497 = vmax.xlane.f32.xlu1 %v494_v27  ;;  %495 = vmax.xlane.f32.xlu0 %v493_v25 }
 0x512   :  { %v498_v28 = vpop.xlane.xlu1 %497  ;;  %v496_v26 = vpop.xlane.xlu0 %495 }
 0x513   :  { %v500_v29 = vsub.f32 %v494_v27, %v498_v28  ;;  %v499_v30 = vsub.f32 %v493_v25, %v496_v26 }
 0x515   :  { %v503_v31 = vmul.f32 1.442695, %v500_v29  ;;  %v501_v32 = vmul.f32 1.442695, %v499_v30 }
 0x517   :  { %677 = vpow2.f32 %v503_v31 }
 0x518   :  { %679 = vpow2.f32 %v501_v32 }
 0x51d   :  { %v678_v33 = vpop.eup %677 }
 0x51e   :  { %v680_v34 = vpop.eup %679  ;;  %507 = vadd.xlane.f32.xlu0 %v678_v33 }
 0x51f   :  { %505 = vadd.xlane.f32.xlu2 %v680_v34 }
 0x591   :  { %v508_v35 = vpop.xlane.xlu0 %507 }
 0x592   :  { %v506_v36 = vpop.xlane.xlu2 %505  ;;  %681 = vlog2.f32 %v508_v35 }
 0x593   :  { %683 = vlog2.f32 %v506_v36 }
 0x598   :  { %v682_v37 = vpop.eup %681 }
 0x599   :  { %v684_v38 = vpop.eup %683  ;;  %v512_v39 = vmul.f32 0.6931472, %v682_v37 }
 0x59a   :  { %v510_v40 = vmul.f32 0.6931472, %v684_v38 }
 0x59b   :  { %v514_v41 = vadd.f32 %v512_v39, %v498_v28 }
 0x59c   :  { %v513_v42 = vadd.f32 %v510_v40, %v496_v26 }
 0x59d   :  { %v516_v43 = vsub.f32 -2.7725887, %v514_v41 }
 0x59e   :  { %v515_v44 = vsub.f32 -2.7725887, %v513_v42 }
 0x59f   :  { %v518_v45 = vmul.f32 %v516_v43, %v966_v63 }
 0x5a0   :  { %v517_v46 = vmul.f32 %v515_v44, %v966_v63 }
 0x5a1   :  { %v520_v47 = vadd.f32 %v518_v45, %v490_v22 }
 0x5a2   :  { %v519_v48 = vadd.f32 %v517_v46, %v490_v22 }
 0x5a3   :  { %v522_v49 = vsub.f32 %v520_v47, %v953_v16 }
 0x5a4   :  { %v521_v50 = vsub.f32 %v519_v48, %v951_v15 }
 0x5a5   :  { %v525_v51 = vmul.f32 1.442695, %v522_v49 }
 0x5a6   :  { %v523_v52 = vmul.f32 1.442695, %v521_v50 }
 0x5a7   :  { %685 = vpow2.f32 %v525_v51 }
 0x5a8   :  { %687 = vpow2.f32 %v523_v52 }
 0x5ad   :  { %v686_v54 = vpop.eup %685 }
 0x5ae   :  { %v688_v55 = vpop.eup %687  ;;  %v528_v56 = vsel %vm39_vm1, %v686_v54, 0.0 }
 0x5af   :  { %v527_v57 = vsel %vm39_vm1, %v688_v55, 0.0  ;;  %v532_v63 = vmul.f32 %v528_v56, %v953_v16  ;;  %530 = vst [vmem:[#allocation3 + $0x8] sm:$0xff] %v528_v56 }
 0x5b0   :  { %529 = vst [vmem:[#allocation3] sm:$0xff] %v527_v57  ;;  %v531_v58 = vmul.f32 %v527_v57, %v951_v15 }
 0x5b1   :  { %558 = dma.vmem_to_hbm [thread:$0]  %s551_s25, 256, %s553_s28, [#allocation4], %s731_s29, %s731_s29, %s732_s30  }
 0x5b2   :  { %v533_v59 = vadd.f32 %v532_v63, %v531_v58 }
 0x5b4   :  { %534 = vadd.xlane.f32.xlu1 %v533_v59 }
 0x627   :  { %v535_v53 = vpop.xlane.xlu1 %534 }
 0x628   :  { %v536_v60 = vrot.slane %v535_v53, 4 }
 0x62a   :  { %v537_v16 = vadd.f32 %v536_v60, %v535_v53 }
 0x62c   :  { %v538_v61 = vrot.slane %v537_v16, 2 }
 0x62e   :  { %v539_v62 = vadd.f32 %v538_v61, %v537_v16 }
 0x630   :  { %v540_v0 = vrot.slane %v539_v62, 1 }
 0x632   :  { %v541_v15 = vadd.f32 %v540_v0, %v539_v62 }
 0x634   :  { %630 = vpush %v541_v15 }
 0x665   :  { %s631_s8 = spop %630 }
 0x666   :  { %s543_s9 = smul.f32 0.1, %s631_s8 }
 0x668   :  { %545 = sst [smem:[#allocation6]] %s543_s9 }
 0x669   :  { %567 = dma.smem_to_hbm %s733_s3, 16, %s565_s7, [#allocation5]  }
 0x66a   :  { %725 = dma.done.wait [#allocation4], 256  }
 0x66b   :  { %726 = vsyncadd [#allocation4], 4294967040 }
 0x66c   :  { %727 = dma.done.wait [#allocation5], 16  }
 0x66d   :  { %728 = vsyncadd [#allocation5], 4294967280 }
 0x66e   :  { %576 = sfence }
 0x66f   :  { %577 = vsyncpa [#allocation4], 1 }
 0x670   :  { %578 = vsyncpa [#allocation5], 1 }

</bundles_post_ra>
